<compile_context>
chip_gen: v7x
topology: tpu7x:2x2x1
jax: 0.10.0
libtpu: 0.0.40
codegen_flags: <defaults>
</compile_context>

<pallas_src>
import functools

import jax
import jax.numpy as jnp
from jax import lax
from jax.experimental import pallas as pl
from jax.experimental.pallas import tpu as pltpu

LANES = 128
TILE_ROWS = 8192                       # (8192, 128) f32 tile = 4 MiB
TILE_ELEMS = TILE_ROWS * LANES
NCORES = 2                             # pass-1 reduction split (sharded on v7x megacore)
EPS = 1e-8


@functools.lru_cache(maxsize=None)
def _vmem_caps():
    """Generation-aware budgets: (fused_max_elems, fused_vmem_limit, tiled_vmem_limit)."""
    phys = 64 << 20                    # conservative default (v7x: 64 MiB per TC)
    try:
        phys = int(getattr(pltpu.get_tpu_info(), "vmem_capacity_bytes", phys)) or phys
    except Exception:
        pass
    if phys >= (100 << 20):            # v5e / v6e: 128 MiB physical VMEM
        return 8 * 1024 * 1024, 110 << 20, 64 << 20     # 32 MiB f32 resident slab cap
    return 4 * 1024 * 1024, 52 << 20, 40 << 20          # v7x / unknown: 16 MiB slab cap


# ---------------------------------------------------------------------------
# Fused path: whole slab resident in VMEM (no grid -> single-buffered),
# stats + normalize in one HBM read + one HBM write.
# ---------------------------------------------------------------------------
def _fused_kernel(x_ref, o_ref, *, n_valid, needs_mask):
    x = x_ref[...].astype(jnp.float32)

    if needs_mask:
        lidx = (lax.broadcasted_iota(jnp.int32, x.shape, 0) * LANES
                + lax.broadcasted_iota(jnp.int32, x.shape, 1))
        valid = lidx < n_valid
        x_sum_in = jnp.where(valid, x, 0.0)
        x_max_in = jnp.where(valid, x, -jnp.inf)
    else:
        valid = None
        x_sum_in = x
        x_max_in = x

    n = jnp.float32(n_valid)
    mean = jnp.sum(x_sum_in) / n
    dev = x - mean
    if needs_mask:
        dev = jnp.where(valid, dev, 0.0)
    m2 = jnp.sum(dev * dev)
    std = jnp.sqrt(m2 / (n - 1.0))
    mx = jnp.max(x_max_in)

    eps = jnp.float32(EPS)
    inv = 1.0 / ((std + eps) * (mx + eps))       # fold the two divides into one mul
    o_ref[...] = ((x - mean) * inv).astype(o_ref.dtype)


# ---------------------------------------------------------------------------
# Pass 1 (tiled path): per-core (count, mean, M2, max) via chunked Welford.
# Grid = (NCORES "parallel", tiles_per_core "arbitrary").
# ---------------------------------------------------------------------------
def _reduce_kernel(x_ref, cnt_ref, mean_ref, m2_ref, max_ref, vmax_sc, *,
                   tiles_per_core, num_tiles, tail_n):
    c = pl.program_id(0)
    j = pl.program_id(1)
    t = c * tiles_per_core + j
    last_tile = num_tiles - 1

    @pl.when(j == 0)
    def _():
        cnt_ref[...] = jnp.zeros_like(cnt_ref)
        mean_ref[...] = jnp.zeros_like(mean_ref)
        m2_ref[...] = jnp.zeros_like(m2_ref)
        max_ref[...] = jnp.full_like(max_ref, -jnp.inf)
        vmax_sc[...] = jnp.full_like(vmax_sc, -jnp.inf)

    x = x_ref[...].astype(jnp.float32)

    def accumulate(x_sum_in, x_max_in, dev_mask, tile_n):
        tile_n_f = jnp.float32(tile_n)
        tile_mean = jnp.sum(x_sum_in) / tile_n_f
        dev = x_sum_in - tile_mean
        if dev_mask is not None:
            dev = jnp.where(dev_mask, dev, 0.0)
        tile_m2 = jnp.sum(dev * dev)

        # Running max: VPU-only partial max into an (8,128) vector accumulator;
        # the single cross-lane reduce is deferred to the last step.
        vmax_sc[...] = jnp.maximum(
            vmax_sc[...],
            jnp.max(x_max_in.reshape(-1, 8, LANES), axis=0))

        # Chan / chunked-Welford combine of this tile into the running stats.
        acc_count = cnt_ref[0, 0, 0]
        acc_mean = mean_ref[0, 0, 0]
        acc_m2 = m2_ref[0, 0, 0]
        new_count = acc_count + tile_n_f
        delta = tile_mean - acc_mean
        cnt_ref[0, 0, 0] = new_count
        mean_ref[0, 0, 0] = acc_mean + delta * (tile_n_f / new_count)
        m2_ref[0, 0, 0] = (acc_m2 + tile_m2
                           + (delta * delta) * (acc_count * tile_n_f / new_count))

    if tail_n < TILE_ELEMS:
        # Full tiles: no iota / no selects.  Steps with t >= num_tiles (padding
        # of the 2-way split) are skipped entirely.
        @pl.when(jnp.logical_and(t < num_tiles, t != last_tile))
        def _():
            accumulate(x, x, None, TILE_ELEMS)

        # Ragged last tile: mask zero-padding and out-of-bounds rows.
        @pl.when(t == last_tile)
        def _():
            lidx = (lax.broadcasted_iota(jnp.int32, x.shape, 0) * LANES
                    + lax.broadcasted_iota(jnp.int32, x.shape, 1))
            valid = lidx < tail_n
            accumulate(jnp.where(valid, x, 0.0),
                       jnp.where(valid, x, -jnp.inf),
                       valid, tail_n)
    else:
        @pl.when(t < num_tiles)
        def _():
            accumulate(x, x, None, TILE_ELEMS)

    @pl.when(j == tiles_per_core - 1)
    def _():
        max_ref[0, 0, 0] = jnp.max(vmax_sc[...])


# ---------------------------------------------------------------------------
# Pass 2 (tiled path): elementwise normalize, (mean, inv) via SMEM.
# ---------------------------------------------------------------------------
def _normalize_kernel(stats_ref, x_ref, o_ref):
    mean = stats_ref[0]
    inv = stats_ref[1]
    o_ref[...] = ((x_ref[...].astype(jnp.float32) - mean) * inv).astype(o_ref.dtype)


def custom_normalize(x, *, _force_path=None):
    """Pallas implementation of CustomNormalize.forward for an arbitrary-shape array."""
    orig_shape = x.shape
    orig_dtype = x.dtype
    n = int(x.size)
    if n == 0:
        return x

    fused_max_elems, fused_vmem_limit, tiled_vmem_limit = _vmem_caps()

    flat = x.reshape(-1)
    pad = (-n) % LANES
    if pad:
        # Only non-128-divisible sizes pay a pad copy; 128-aligned inputs of any
        # size go through with zero wrapper copies.
        # TODO(synk): for very large non-128-divisible inputs this pad (and the
        # matching final slice) still moves ~4n extra bytes; a fully copy-free
        # route needs the kernels to consume an unpadded 1-D slab directly.
        flat = jnp.pad(flat, (0, pad))
    rows = (n + pad) // LANES
    x2d = flat.reshape(rows, LANES)

    use_fused = rows * LANES <= fused_max_elems
    if _force_path == "fused":
        use_fused = True
    elif _force_path == "tiled":
        use_fused = False

    if use_fused:
        # -------------------- fused single-HBM-pass kernel -------------------
        y2d = pl.pallas_call(
            functools.partial(_fused_kernel, n_valid=n, needs_mask=bool(pad)),
            out_shape=jax.ShapeDtypeStruct((rows, LANES), orig_dtype),
            in_specs=[pl.BlockSpec(memory_space=pltpu.MemorySpace.VMEM)],
            out_specs=pl.BlockSpec(memory_space=pltpu.MemorySpace.VMEM),
            compiler_params=pltpu.CompilerParams(
                vmem_limit_bytes=fused_vmem_limit),
        )(x2d)
    else:
        # -------------------- pass 1: tiled global reductions ----------------
        num_tiles = pl.cdiv(rows, TILE_ROWS)
        tiles_per_core = pl.cdiv(num_tiles, NCORES)
        tail_n = n - (num_tiles - 1) * TILE_ELEMS     # valid elems in last tile

        def x_map(c, j):
            # Clamp so padding steps of the 2-way split never index past the
            # last real block (their accumulation is skipped in-kernel).
            return (jnp.minimum(c * tiles_per_core + j, num_tiles - 1), 0)

        stat_shape = jax.ShapeDtypeStruct((NCORES, 1, 1), jnp.float32)
        stat_spec = pl.BlockSpec((1, 1, 1), lambda c, j: (c, 0, 0))

        cnt_o, mean_o, m2_o, max_o = pl.pallas_call(
            functools.partial(_reduce_kernel,
                              tiles_per_core=tiles_per_core,
                              num_tiles=num_tiles,
                              tail_n=tail_n),
            out_shape=(stat_shape,) * 4,
            grid=(NCORES, tiles_per_core),
            in_specs=[pl.BlockSpec((TILE_ROWS, LANES), x_map)],
            out_specs=(stat_spec,) * 4,
            scratch_shapes=[pltpu.VMEM((8, LANES), jnp.float32)],
            compiler_params=pltpu.CompilerParams(
                dimension_semantics=("parallel", "arbitrary"),
                vmem_limit_bytes=tiled_vmem_limit),
        )(x2d)

        # Merge the per-core partials (parallel Welford combine) and finalize
        # the two scalars with a handful of tiny XLA ops.
        c0, c1 = cnt_o[0, 0, 0], cnt_o[1, 0, 0]
        mu0, mu1 = mean_o[0, 0, 0], mean_o[1, 0, 0]
        m20, m21 = m2_o[0, 0, 0], m2_o[1, 0, 0]
        tot = c0 + c1
        delta = mu1 - mu0
        mean = mu0 + delta * (c1 / tot)
        m2 = m20 + m21 + (delta * delta) * (c0 * c1 / tot)
        mx = jnp.maximum(max_o[0, 0, 0], max_o[1, 0, 0])

        nf = jnp.float32(n)
        std = jnp.sqrt(m2 / (nf - 1.0))
        eps = jnp.float32(EPS)
        inv = 1.0 / ((std + eps) * (mx + eps))
        stats = jnp.stack([mean, inv])               # (2,) f32 -> SMEM

        # -------------------- pass 2: elementwise normalize ------------------
        tile_spec = pl.BlockSpec((TILE_ROWS, LANES), lambda i: (i, 0))
        y2d = pl.pallas_call(
            _normalize_kernel,
            out_shape=jax.ShapeDtypeStruct((rows, LANES), orig_dtype),
            grid=(num_tiles,),
            in_specs=[pl.BlockSpec(memory_space=pltpu.MemorySpace.SMEM),
                      tile_spec],
            out_specs=tile_spec,
            compiler_params=pltpu.CompilerParams(
                dimension_semantics=("parallel",),
                vmem_limit_bytes=tiled_vmem_limit),
        )(stats, x2d)

    y = y2d.reshape(-1)
    if pad:
        y = y[:n]
    return y.reshape(orig_shape)


def _reference(x):
    x = x.astype(jnp.float32)
    max_val = jnp.max(x)
    std_dev = jnp.std(x, ddof=1)       # torch.std default is unbiased
    normalized = (x - jnp.mean(x)) / (std_dev + EPS)
    return normalized / (max_val + EPS)


if __name__ == "__main__":
    key = jax.random.PRNGKey(0)
    k0, k1, k2 = jax.random.split(key, 3)

    # 1) Small NCHW input -> fused single-pass path, 128-aligned (zero wrapper copies).
    x1 = jax.random.normal(k0, (2, 4, 16, 16), dtype=jnp.float32)
    y1 = jax.block_until_ready(custom_normalize(x1))
    r1 = _reference(x1)
    assert y1.shape == x1.shape and y1.dtype == x1.dtype
    assert jnp.allclose(y1, r1, atol=5e-5, rtol=5e-5), (
        float(jnp.max(jnp.abs(y1 - r1))))

    # 2) Small non-128-divisible input -> fused path with tail padding + masking
    #    (also exercises a row count that is not a multiple of 8).
    x2 = jax.random.normal(k1, (2, 4, 9, 9), dtype=jnp.float32)
    y2 = jax.block_until_ready(custom_normalize(x2))
    r2 = _reference(x2)
    assert y2.shape == x2.shape and y2.dtype == x2.dtype
    assert jnp.allclose(y2, r2, atol=5e-5, rtol=5e-5), (
        float(jnp.max(jnp.abs(y2 - r2))))

    # 3) Force the tiled two-pass path: 2 tiles, both reduce "cores" active,
    #    ragged tail tile, ragged pass-2 output block, 128-aligned (no pad/slice).
    x3 = jax.random.normal(k2, (4, 4, 256, 300), dtype=jnp.float32)
    y3 = jax.block_until_ready(custom_normalize(x3, _force_path="tiled"))
    r3 = _reference(x3)
    assert y3.shape == x3.shape and y3.dtype == x3.dtype
    assert jnp.allclose(y3, r3, atol=1e-4, rtol=1e-4), (
        float(jnp.max(jnp.abs(y3 - r3))))

    print("KERNEL_OK")
</pallas_src>

<mosaic_0001>
module attributes {stable_mosaic.version = 11 : i64} {
  func.func @_fused_kernel(%arg0: memref<16x128xf32, #tpu.memory_space<vmem>>, %arg1: memref<16x128xf32, #tpu.memory_space<vmem>>) attributes {dimension_semantics = [], scalar_prefetch = 0 : i64, scratch_operands = 0 : i64, tpu.core_type = #tpu.core_type<tc>} {
    %c0 = arith.constant 0 : index
    %c0_0 = arith.constant 0 : index
    %0 = vector.load %arg0[%c0, %c0_0] : memref<16x128xf32, #tpu.memory_space<vmem>>, vector<16x128xf32>
    %1 = vector.shape_cast %0 : vector<16x128xf32> to vector<1x16x128xf32>
    %cst = arith.constant dense<0.000000e+00> : vector<1xf32>
    %2 = vector.multi_reduction <add>, %1, %cst [1, 2] : vector<1x16x128xf32> to vector<1xf32>
    %3 = vector.shape_cast %2 : vector<1xf32> to vector<1x1x1xf32>
    %4 = vector.extract %3[0, 0, 0] : f32 from vector<1x1x1xf32>
    %cst_1 = arith.constant 2.048000e+03 : f32
    %5 = arith.divf %4, %cst_1 : f32
    %6 = vector.broadcast %5 : f32 to vector<16x128xf32>
    %7 = arith.subf %0, %6 : vector<16x128xf32>
    %8 = arith.mulf %7, %7 : vector<16x128xf32>
    %9 = vector.shape_cast %8 : vector<16x128xf32> to vector<1x16x128xf32>
    %cst_2 = arith.constant dense<0.000000e+00> : vector<1xf32>
    %10 = vector.multi_reduction <add>, %9, %cst_2 [1, 2] : vector<1x16x128xf32> to vector<1xf32>
    %11 = vector.shape_cast %10 : vector<1xf32> to vector<1x1x1xf32>
    %12 = vector.extract %11[0, 0, 0] : f32 from vector<1x1x1xf32>
    %cst_3 = arith.constant 2.048000e+03 : f32
    %cst_4 = arith.constant 1.000000e+00 : f32
    %13 = arith.subf %cst_3, %cst_4 : f32
    %14 = arith.divf %12, %13 : f32
    %15 = math.sqrt %14 : f32
    %16 = vector.shape_cast %0 : vector<16x128xf32> to vector<1x16x128xf32>
    %cst_5 = arith.constant dense<0xFF800000> : vector<1xf32>
    %17 = vector.multi_reduction <maximumf>, %16, %cst_5 [1, 2] : vector<1x16x128xf32> to vector<1xf32>
    %18 = vector.shape_cast %17 : vector<1xf32> to vector<1x1x1xf32>
    %19 = vector.extract %18[0, 0, 0] : f32 from vector<1x1x1xf32>
    %cst_6 = arith.constant 9.99999993E-9 : f32
    %20 = arith.addf %15, %cst_6 : f32
    %cst_7 = arith.constant 9.99999993E-9 : f32
    %21 = arith.addf %19, %cst_7 : f32
    %22 = arith.mulf %20, %21 : f32
    %cst_8 = arith.constant 1.000000e+00 : f32
    %23 = arith.divf %cst_8, %22 : f32
    %24 = vector.broadcast %5 : f32 to vector<16x128xf32>
    %25 = arith.subf %0, %24 : vector<16x128xf32>
    %26 = vector.broadcast %23 : f32 to vector<16x128xf32>
    %27 = arith.mulf %25, %26 : vector<16x128xf32>
    %c0_9 = arith.constant 0 : index
    %c0_10 = arith.constant 0 : index
    %28 = vector.load %arg1[%c0_9, %c0_10] : memref<16x128xf32, #tpu.memory_space<vmem>>, vector<16x128xf32>
    tpu.vector_store %arg1[%c0_9, %c0_10], %27 {strides = array<i32>} : memref<16x128xf32, #tpu.memory_space<vmem>>, vector<16x128xf32>,
    return
  }
}

</mosaic_0001>

<bundles_post_ra>
// kernel: tpu_custom_call.1
= control target key start
LH: loop header
LB: loop body
LE: loop exit
PB: predicated region body
PF: predicated region fallthrough
CT: control target
= control target key end

     0   :  { %6 = vsyncpa [#allocation3], 0  ;;  %s213_s0 = inlined_call_operand.hbm [shape: f32[16,128], index: 0, kind: input, shape index: {}]   ;;  %s214_s1 = inlined_call_operand.hbm [shape: f32[16,128], index: 1, kind: output, shape index: {}]  }
   0x1   :  { %7 = vsyncpa [#allocation4], 0  ;;  %s169_s6 = smov [#allocation2]   ;;  %s121_s10 = scalar_lea.hbm %s213_s0, 256 }
   0x2   :  { %s13_s7 = sshll.u32 %s169_s6, 4  ;;  %p122_p0 = scmp.ne.s32.totalorder %s213_s0, %s121_s10  ;;  %s14_s7 = int_to_ptr.vmem [resolvable:$true] %s13_s7 }
   0x3   :  { %p125_p1 = scmp.lt.u32.totalorder %s121_s10, %s213_s0 }
   0x5   :  { %p127_p2 = pnand %p125_p1, %p122_p0 }
   0x7   :  { %130 = shalt.err (!%p127_p2)
}
   0x8   :  { %s131_s15 = scalar_lea.vmem %s14_s7, 256  ;;  %p136_p4 = scmp.lt.s32.totalorder %s14_s7, %s14_s7 }
   0x9   :  { %p132_p3 = scmp.ne.s32.totalorder %s14_s7, %s131_s15  ;;  %p137_p5 = scmp.lt.s32.totalorder %s131_s15, %s131_s15 }
   0xb   :  { %p138_p6 = por %p137_p5, %p136_p4 }
   0xd   :  { %p139_p7 = pnand %p138_p6, %p132_p3 }
   0xf   :  { %142 = shalt.err (!%p139_p7)
}
  0x10   :  { %s170_s16 = smov 128   ;;  %s171_s17 = smov 8  }
  0x11   :  { %19 = dma.hbm_to_vmem [thread:$0]  %s213_s0, 256, %s14_s7, [#allocation3], %s170_s16, %s170_s16, %s171_s17  }
  0x12   :  { %165 = dma.done.wait [#allocation3], 256  }
  0x13   :  { %166 = vsyncadd [#allocation3], 4294967040  ;;  %v23_v0 = vld [vmem:[#allocation2] sm:$0xff]  ;;  %v24_v1 = vld [vmem:[#allocation2 + $0x8] sm:$0xff]  ;;  %s172_s28 = smov [#allocation5]  }
  0x14   :  { %v25_v2 = vadd.f32 %v24_v1, %v23_v0  ;;  %v65_v3 = vmax.f32 %v23_v0, %v24_v1  ;;  %s91_s29 = sshll.u32 %s172_s28, 4  ;;  %s92_s29 = int_to_ptr.vmem [resolvable:$true] %s91_s29 }
  0x15   :  { %s143_s2 = scalar_lea.vmem %s92_s29, 256  ;;  %p148_p9 = scmp.lt.s32.totalorder %s92_s29, %s92_s29 }
  0x16   :  { %26 = vadd.xlane.f32.xlu0 %v25_v2  ;;  %66 = vmax.xlane.f32.xlu1 %v65_v3  ;;  %p144_p8 = scmp.ne.s32.totalorder %s92_s29, %s143_s2  ;;  %p149_p10 = scmp.lt.s32.totalorder %s143_s2, %s143_s2 }
  0x18   :  { %p150_p11 = por %p149_p10, %p148_p9 }
  0x1a   :  { %p151_p12 = pnand %p150_p11, %p144_p8 }
  0xa3   :  { %v27_v4 = vpop.xlane.xlu0 %26  ;;  %v67_v24 = vpop.xlane.xlu1 %66 }
  0xa4   :  { %v28_v5 = vrot.slane %v27_v4, 4  ;;  %v68_v25 = vrot.slane %v67_v24, 4 }
  0xa6   :  { %v29_v6 = vadd.f32 %v28_v5, %v27_v4  ;;  %v69_v26 = vmax.f32 %v67_v24, %v68_v25 }
  0xa8   :  { %v30_v7 = vrot.slane %v29_v6, 2  ;;  %v70_v28 = vrot.slane %v69_v26, 2 }
  0xaa   :  { %v31_v8 = vadd.f32 %v30_v7, %v29_v6  ;;  %v71_v29 = vmax.f32 %v69_v26, %v70_v28 }
  0xac   :  { %v32_v9 = vrot.slane %v31_v8, 1  ;;  %v72_v31 = vrot.slane %v71_v29, 1 }
  0xae   :  { %v33_v10 = vadd.f32 %v32_v9, %v31_v8  ;;  %v73_v36 = vmax.f32 %v71_v29, %v72_v31 }
  0xb0   :  { %103 = vpush %v33_v10 }
  0xe1   :  { %s104_s20 = spop %103 }
  0xe2   :  { %s37_s21 = smul.f32 0.00048828125, %s104_s20 }
  0xe4   :  { %v38_v11 = vstv %s37_s21 }
  0xe5   :  { %v39_v12 = vsub.f32 %v23_v0, %v38_v11  ;;  %v40_v13 = vsub.f32 %v24_v1, %v38_v11 }
  0xe7   :  { %v41_v14 = vmul.f32 %v39_v12, %v39_v12  ;;  %v42_v15 = vmul.f32 %v40_v13, %v40_v13 }
  0xe9   :  { %v43_v16 = vadd.f32 %v42_v15, %v41_v14 }
  0xeb   :  { %44 = vadd.xlane.f32.xlu0 %v43_v16 }
 0x178   :  { %v45_v17 = vpop.xlane.xlu0 %44 }
 0x179   :  { %v46_v18 = vrot.slane %v45_v17, 4 }
 0x17b   :  { %v47_v19 = vadd.f32 %v46_v18, %v45_v17 }
 0x17d   :  { %v48_v20 = vrot.slane %v47_v19, 2 }
 0x17f   :  { %v49_v21 = vadd.f32 %v48_v20, %v47_v19 }
 0x181   :  { %v50_v22 = vrot.slane %v49_v21, 1 }
 0x183   :  { %v51_v23 = vadd.f32 %v50_v22, %v49_v21 }
 0x185   :  { %105 = vpush %v51_v23 }
 0x1b6   :  { %s106_s0 = spop %105 }
 0x1b7   :  { %s55_s22 = smul.f32 0.0004885198, %s106_s0 }
 0x1b9   :  { %v56_v27 = vstv %s55_s22 }
 0x1ba   :  { %117 = vrsqrt.f32 %v56_v27  ;;  %vm59_vm0 = vcmp.eq.f32.partialorder %v56_v27, inf  ;;  %v62_v33 = vand.u32 2147483648, %v56_v27  ;;  %vm61_vm1 = vcmp.eq.f32.partialorder %v56_v27, 0.0 }
 0x1c4   :  { %v118_v30 = vpop.eup %117 }
 0x1c5   :  { %v58_v32 = vmul.f32 %v118_v30, %v56_v27 }
 0x1c7   :  { %v60_v34 = vsel %vm59_vm0, %v56_v27, %v58_v32 }
 0x1c8   :  { %v63_v35 = vsel %vm61_vm1, %v62_v33, %v60_v34 }
 0x1c9   :  { %107 = vpush %v63_v35 }
 0x1ca   :  { %109 = vpush %v73_v36 }
 0x1fa   :  { %s108_s23 = spop %107 }
 0x1fb   :  { %s75_s24 = sadd.f32 1e-08, %s108_s23  ;;  %s110_s25 = spop %109 }
 0x1fc   :  { %s76_s26 = sadd.f32 1e-08, %s110_s25 }
 0x1fe   :  { %s77_s27 = smul.f32 %s76_s26, %s75_s24 }
 0x200   :  { %v78_v37 = vstv %s77_s27 }
 0x201   :  { %119 = vrcp.f32 %v78_v37 }
 0x20b   :  { %v120_v38 = vpop.eup %119 }
 0x20c   :  { %111 = vpush %v120_v38 }
 0x23d   :  { %s112_s30 = spop %111 }
 0x23e   :  { %v81_v39 = vstv %s112_s30 }
 0x23f   :  { %v82_v40 = vmul.f32 %v81_v39, %v39_v12  ;;  %v83_v41 = vmul.f32 %v81_v39, %v40_v13 }
 0x241   :  { %84 = vst [vmem:[#allocation5] sm:$0xff] %v82_v40  ;;  %85 = vst [vmem:[#allocation5 + $0x8] sm:$0xff] %v83_v41 }
 0x242   :  { %154 = shalt.err (!%p151_p12)
}
 0x243   :  { %s155_s5 = scalar_lea.hbm %s214_s1, 256 }
 0x244   :  { %p156_p13 = scmp.ne.s32.totalorder %s214_s1, %s155_s5  ;;  %p159_p0 = scmp.lt.u32.totalorder %s155_s5, %s214_s1 }
 0x246   :  { %p161_p1 = pnand %p159_p0, %p156_p13 }
 0x248   :  { %164 = shalt.err (!%p161_p1)
}
 0x249   :  { %97 = dma.vmem_to_hbm [thread:$0]  %s92_s29, 256, %s214_s1, [#allocation4], %s170_s16, %s170_s16, %s171_s17  }
 0x24a   :  { %167 = dma.done.wait [#allocation4], 256  }
 0x24b   :  { %168 = vsyncadd [#allocation4], 4294967040 }
 0x24c   :  { %101 = vsyncpa [#allocation3], 1 }
 0x24d   :  { %102 = vsyncpa [#allocation4], 1 }

</bundles_post_ra>
